<compile_context>
chip_gen: v6e
topology: v6e:2x2x1
jax: 0.10.0
libtpu: 0.0.40
codegen_flags: <defaults>
</compile_context>

<pallas_src>
import functools

import jax
import jax.numpy as jnp
import numpy as np
from jax.experimental import pallas as pl
from jax.experimental.pallas import tpu as pltpu


# ----------------------------------------------------------------------------
# Fused kernel: projections + per-head attention + fc_out, one (batch, q-tile) per step.
# ----------------------------------------------------------------------------
def _fused_self_attention_kernel(q_ref, k_ref, v_ref, bias_ref,
                                 wq_ref, wk_ref, wv_ref, wo_ref, bo_ref,
                                 o_ref, *, heads, head_dim, inv_scale):
    # q_ref:    (tq, E)      heads packed along E
    # k_ref:    (Lk, E)
    # v_ref:    (Lk, E)
    # bias_ref: (tq, Lk)     additive mask bias (0 visible, -1e20 masked)
    # wq/wk/wv: (E, E)       block-diagonal head projections (x @ W == torch Linear)
    # wo:       (E, E)       fc_out weight, stored (in, out)
    # bo:       (1, E)       fc_out bias
    # o_ref:    (tq, E)
    D = head_dim

    # All-head projections: one big MXU matmul each.
    q = jnp.dot(q_ref[...], wq_ref[...], preferred_element_type=jnp.float32)
    k = jnp.dot(k_ref[...], wk_ref[...], preferred_element_type=jnp.float32)
    v = jnp.dot(v_ref[...], wv_ref[...], preferred_element_type=jnp.float32)

    # Fold the 1/sqrt(embed) softmax scale into q: (tq, E) work instead of (tq, Lk).
    # (The PyTorch module masks before scaling; adding -1e20 to already-scaled scores
    #  is equivalent — both underflow to exactly 0 after exp.)
    q = q * jnp.float32(inv_scale)
    bias = bias_ref[...]
    wo = wo_ref[...]

    # fc_out is fused as a sum over per-head row-slices of W_out, so no explicit
    # head-concat tensor is materialized; the accumulator is the lane-dense (tq, E) slab.
    acc = jnp.zeros(o_ref.shape, jnp.float32)
    for h in range(heads):                      # static unroll over heads
        lo, hi = h * D, (h + 1) * D
        q_h, k_h, v_h = q[:, lo:hi], k[:, lo:hi], v[:, lo:hi]

        # QK^T without materializing k.T: contract D on both operands.
        s = jax.lax.dot_general(
            q_h, k_h, dimension_numbers=(((1,), (1,)), ((), ())),
            preferred_element_type=jnp.float32)          # (tq, Lk)
        s = s + bias

        # softmax over keys (normalization deferred to after PV)
        m = jnp.max(s, axis=-1, keepdims=True)
        e = jnp.exp(s - m)
        denom = jnp.sum(e, axis=-1, keepdims=True)

        pv = jnp.dot(e, v_h, preferred_element_type=jnp.float32)    # (tq, D)
        out_h = pv * pl.reciprocal(denom, approx=False)

        # This head's contribution to fc_out: (tq, D) @ (D, E)
        acc = acc + jnp.dot(out_h, wo[lo:hi, :], preferred_element_type=jnp.float32)

    o_ref[...] = (acc + bo_ref[...]).astype(o_ref.dtype)


# ----------------------------------------------------------------------------
# Wrapper
# ----------------------------------------------------------------------------
def self_attention_forward(values, keys, query, mask, params, *, embed_size, heads):
    """values/keys/query: (B, L, E) float32.  mask: (B, 1, Lq, Lk), 0 = masked out."""
    B, Lq, E = query.shape
    Lk = keys.shape[1]
    Lv = values.shape[1]
    H = heads
    D = embed_size // heads
    assert E == embed_size and D * H == E
    assert Lk == Lv, "attention requires key_len == value_len"

    # Expand the shared per-head (D, D) weights into block-diagonal (E, E) matrices
    # once, so every projection is a single large MXU matmul covering all heads.
    def block_diag(w):
        bd = jnp.zeros((E, E), jnp.float32)
        for h in range(H):
            bd = bd.at[h * D:(h + 1) * D, h * D:(h + 1) * D].set(w)
        return bd

    wq_bd = block_diag(params["wq"])
    wk_bd = block_diag(params["wk"])
    wv_bd = block_diag(params["wv"])

    # Precompute the mask as an additive float bias (same for every head).
    bias = jnp.where(mask[:, 0, :, :] == 0, jnp.float32(-1e20), jnp.float32(0.0))

    inv_scale = 1.0 / (float(embed_size) ** 0.5)

    # q-tile: full Lq for short sequences, 128 rows per step otherwise.
    tq = 128 if (Lq % 128 == 0) else Lq
    grid = (B, Lq // tq)

    kernel = functools.partial(_fused_self_attention_kernel,
                               heads=H, head_dim=D, inv_scale=inv_scale)

    return pl.pallas_call(
        kernel,
        out_shape=jax.ShapeDtypeStruct((B, Lq, E), jnp.float32),
        grid=grid,
        in_specs=[
            pl.BlockSpec((None, tq, E), lambda b, i: (b, i, 0)),    # query
            pl.BlockSpec((None, Lk, E), lambda b, i: (b, 0, 0)),    # keys
            pl.BlockSpec((None, Lv, E), lambda b, i: (b, 0, 0)),    # values
            pl.BlockSpec((None, tq, Lk), lambda b, i: (b, i, 0)),   # additive mask bias
            pl.BlockSpec((E, E), lambda b, i: (0, 0)),              # Wq (block-diag)
            pl.BlockSpec((E, E), lambda b, i: (0, 0)),              # Wk (block-diag)
            pl.BlockSpec((E, E), lambda b, i: (0, 0)),              # Wv (block-diag)
            pl.BlockSpec((E, E), lambda b, i: (0, 0)),              # W_out
            pl.BlockSpec((1, E), lambda b, i: (0, 0)),              # b_out
        ],
        out_specs=pl.BlockSpec((None, tq, E), lambda b, i: (b, i, 0)),
        compiler_params=pltpu.CompilerParams(
            dimension_semantics=("parallel", "parallel")),
    )(query, keys, values, bias, wq_bd, wk_bd, wv_bd,
      params["w_out"], params["b_out"])


# ----------------------------------------------------------------------------
# Pure-JAX reference (mirrors the PyTorch forward) for a correctness check.
# ----------------------------------------------------------------------------
def self_attention_reference(values, keys, query, mask, params, *, embed_size, heads):
    B, Lq, E = query.shape
    H, D = heads, embed_size // heads
    v = values.reshape(B, -1, H, D) @ params["wv"]
    k = keys.reshape(B, -1, H, D) @ params["wk"]
    q = query.reshape(B, -1, H, D) @ params["wq"]
    qk = jnp.einsum("bqhd,bkhd->bhqk", q, k)
    qk = jnp.where(mask == 0, jnp.float32(-1e20), qk)
    attn = jax.nn.softmax(qk / (embed_size ** 0.5), axis=3)
    out = jnp.einsum("bhql,blhd->bqhd", attn, v).reshape(B, Lq, H * D)
    return out @ params["w_out"] + params["b_out"][0]


if __name__ == "__main__":
    # Small shapes consistent with the module.
    embed_size, heads = 32, 4
    head_dim = embed_size // heads
    B, L = 2, 8

    key = jax.random.PRNGKey(0)
    kv, kk, kq, kwv, kwk, kwq, kwo, kbo, km = jax.random.split(key, 9)

    values = jax.random.normal(kv, (B, L, embed_size), dtype=jnp.float32)
    keys_x = jax.random.normal(kk, (B, L, embed_size), dtype=jnp.float32)
    query = jax.random.normal(kq, (B, L, embed_size), dtype=jnp.float32)

    # Deterministic parameter init (stored already transposed so x @ W == torch Linear).
    params = {
        "wv": jax.random.normal(kwv, (head_dim, head_dim), dtype=jnp.float32) * 0.1,
        "wk": jax.random.normal(kwk, (head_dim, head_dim), dtype=jnp.float32) * 0.1,
        "wq": jax.random.normal(kwq, (head_dim, head_dim), dtype=jnp.float32) * 0.1,
        "w_out": jax.random.normal(kwo, (embed_size, embed_size), dtype=jnp.float32) * 0.1,
        "b_out": jax.random.normal(kbo, (1, embed_size), dtype=jnp.float32) * 0.1,
    }

    # Mask: (B, 1, Lq, Lk), 0 = masked out. Randomly mask some keys but keep at
    # least the first key visible so every row has a valid softmax.
    mask = (jax.random.uniform(km, (B, 1, L, L)) > 0.3).astype(jnp.int32)
    mask = mask.at[:, :, :, 0].set(1)

    out = self_attention_forward(values, keys_x, query, mask, params,
                                 embed_size=embed_size, heads=heads)
    out = jax.block_until_ready(out)

    ref = self_attention_reference(values, keys_x, query, mask, params,
                                   embed_size=embed_size, heads=heads)
    np.testing.assert_allclose(np.asarray(out), np.asarray(ref), rtol=1e-5, atol=1e-5)

    print("KERNEL_OK")
</pallas_src>

<mosaic_0001>
module attributes {stable_mosaic.version = 11 : i64} {
  func.func @_fused_self_attention_kernel(%arg0: i32, %arg1: i32, %arg2: memref<1x8x32xf32, #tpu.memory_space<vmem>>, %arg3: memref<1x8x32xf32, #tpu.memory_space<vmem>>, %arg4: memref<1x8x32xf32, #tpu.memory_space<vmem>>, %arg5: memref<1x8x8xf32, #tpu.memory_space<vmem>>, %arg6: memref<32x32xf32, #tpu.memory_space<vmem>>, %arg7: memref<32x32xf32, #tpu.memory_space<vmem>>, %arg8: memref<32x32xf32, #tpu.memory_space<vmem>>, %arg9: memref<32x32xf32, #tpu.memory_space<vmem>>, %arg10: memref<1x32xf32, #tpu.memory_space<vmem>>, %arg11: memref<1x8x32xf32, #tpu.memory_space<vmem>>) attributes {dimension_semantics = [#tpu.dimension_semantics<parallel>, #tpu.dimension_semantics<parallel>], iteration_bounds = array<i64: 2, 1>, scalar_prefetch = 0 : i64, scratch_operands = 0 : i64, tpu.core_type = #tpu.core_type<tc>, window_params = [{transform_indices = @transform_0, window_bounds = array<i64: 1, 8, 32>}, {transform_indices = @transform_1, window_bounds = array<i64: 1, 8, 32>}, {transform_indices = @transform_2, window_bounds = array<i64: 1, 8, 32>}, {transform_indices = @transform_3, window_bounds = array<i64: 1, 8, 8>}, {pipeline_mode = #tpu.pipeline_mode<synchronous>, transform_indices = @transform_4, window_bounds = array<i64: 32, 32>}, {pipeline_mode = #tpu.pipeline_mode<synchronous>, transform_indices = @transform_5, window_bounds = array<i64: 32, 32>}, {pipeline_mode = #tpu.pipeline_mode<synchronous>, transform_indices = @transform_6, window_bounds = array<i64: 32, 32>}, {pipeline_mode = #tpu.pipeline_mode<synchronous>, transform_indices = @transform_7, window_bounds = array<i64: 32, 32>}, {pipeline_mode = #tpu.pipeline_mode<synchronous>, transform_indices = @transform_8, window_bounds = array<i64: 1, 32>}, {transform_indices = @transform_9, window_bounds = array<i64: 1, 8, 32>}]} {
    %c0 = arith.constant 0 : index
    %c0_0 = arith.constant 0 : index
    %c0_1 = arith.constant 0 : index
    %0 = vector.load %arg2[%c0, %c0_0, %c0_1] : memref<1x8x32xf32, #tpu.memory_space<vmem>>, vector<1x8x32xf32>
    %1 = vector.shape_cast %0 : vector<1x8x32xf32> to vector<8x32xf32>
    %c0_2 = arith.constant 0 : index
    %c0_3 = arith.constant 0 : index
    %2 = vector.load %arg6[%c0_2, %c0_3] : memref<32x32xf32, #tpu.memory_space<vmem>>, vector<32x32xf32>
    %cst = arith.constant dense<0.000000e+00> : vector<8x32xf32>
    %3 = tpu.matmul %1, %2, %cst {dimension_numbers = #tpu.dot_dimension_numbers<[1], [0], [0], [1], [0, 0, 1, 1], [], []>} : vector<8x32xf32>, vector<32x32xf32>, vector<8x32xf32> -> vector<8x32xf32>
    %c0_4 = arith.constant 0 : index
    %c0_5 = arith.constant 0 : index
    %c0_6 = arith.constant 0 : index
    %4 = vector.load %arg3[%c0_4, %c0_5, %c0_6] : memref<1x8x32xf32, #tpu.memory_space<vmem>>, vector<1x8x32xf32>
    %5 = vector.shape_cast %4 : vector<1x8x32xf32> to vector<8x32xf32>
    %c0_7 = arith.constant 0 : index
    %c0_8 = arith.constant 0 : index
    %6 = vector.load %arg7[%c0_7, %c0_8] : memref<32x32xf32, #tpu.memory_space<vmem>>, vector<32x32xf32>
    %cst_9 = arith.constant dense<0.000000e+00> : vector<8x32xf32>
    %7 = tpu.matmul %5, %6, %cst_9 {dimension_numbers = #tpu.dot_dimension_numbers<[1], [0], [0], [1], [0, 0, 1, 1], [], []>} : vector<8x32xf32>, vector<32x32xf32>, vector<8x32xf32> -> vector<8x32xf32>
    %c0_10 = arith.constant 0 : index
    %c0_11 = arith.constant 0 : index
    %c0_12 = arith.constant 0 : index
    %8 = vector.load %arg4[%c0_10, %c0_11, %c0_12] : memref<1x8x32xf32, #tpu.memory_space<vmem>>, vector<1x8x32xf32>
    %9 = vector.shape_cast %8 : vector<1x8x32xf32> to vector<8x32xf32>
    %c0_13 = arith.constant 0 : index
    %c0_14 = arith.constant 0 : index
    %10 = vector.load %arg8[%c0_13, %c0_14] : memref<32x32xf32, #tpu.memory_space<vmem>>, vector<32x32xf32>
    %cst_15 = arith.constant dense<0.000000e+00> : vector<8x32xf32>
    %11 = tpu.matmul %9, %10, %cst_15 {dimension_numbers = #tpu.dot_dimension_numbers<[1], [0], [0], [1], [0, 0, 1, 1], [], []>} : vector<8x32xf32>, vector<32x32xf32>, vector<8x32xf32> -> vector<8x32xf32>
    %cst_16 = arith.constant 0.176776692 : f32
    %12 = vector.broadcast %cst_16 : f32 to vector<8x32xf32>
    %13 = arith.mulf %3, %12 : vector<8x32xf32>
    %c0_17 = arith.constant 0 : index
    %c0_18 = arith.constant 0 : index
    %c0_19 = arith.constant 0 : index
    %14 = vector.load %arg5[%c0_17, %c0_18, %c0_19] : memref<1x8x8xf32, #tpu.memory_space<vmem>>, vector<1x8x8xf32>
    %15 = vector.shape_cast %14 : vector<1x8x8xf32> to vector<8x8xf32>
    %c0_20 = arith.constant 0 : index
    %c0_21 = arith.constant 0 : index
    %16 = vector.load %arg9[%c0_20, %c0_21] : memref<32x32xf32, #tpu.memory_space<vmem>>, vector<32x32xf32>
    %cst_22 = arith.constant 0.000000e+00 : f32
    %17 = vector.broadcast %cst_22 : f32 to vector<8x32xf32>
    %18 = vector.extract_strided_slice %13 {offsets = [0, 0], sizes = [8, 8], strides = [1, 1]} : vector<8x32xf32> to vector<8x8xf32>
    %19 = vector.extract_strided_slice %7 {offsets = [0, 0], sizes = [8, 8], strides = [1, 1]} : vector<8x32xf32> to vector<8x8xf32>
    %20 = vector.extract_strided_slice %11 {offsets = [0, 0], sizes = [8, 8], strides = [1, 1]} : vector<8x32xf32> to vector<8x8xf32>
    %cst_23 = arith.constant dense<0.000000e+00> : vector<8x8xf32>
    %21 = tpu.matmul %18, %19, %cst_23 {dimension_numbers = #tpu.dot_dimension_numbers<[1], [1], [0], [0], [0, 0, 1, 0], [], []>} : vector<8x8xf32>, vector<8x8xf32>, vector<8x8xf32> -> vector<8x8xf32>
    %22 = arith.addf %21, %15 : vector<8x8xf32>
    %cst_24 = arith.constant dense<0xFF800000> : vector<8xf32>
    %23 = vector.multi_reduction <maximumf>, %22, %cst_24 [1] : vector<8x8xf32> to vector<8xf32>
    %24 = vector.shape_cast %23 : vector<8xf32> to vector<8x1xf32>
    %25 = vector.broadcast %24 : vector<8x1xf32> to vector<8x8xf32>
    %26 = arith.subf %22, %25 : vector<8x8xf32>
    %27 = math.exp %26 : vector<8x8xf32>
    %cst_25 = arith.constant dense<0.000000e+00> : vector<8xf32>
    %28 = vector.multi_reduction <add>, %27, %cst_25 [1] : vector<8x8xf32> to vector<8xf32>
    %29 = vector.shape_cast %28 : vector<8xf32> to vector<8x1xf32>
    %cst_26 = arith.constant dense<0.000000e+00> : vector<8x8xf32>
    %30 = tpu.matmul %27, %20, %cst_26 {dimension_numbers = #tpu.dot_dimension_numbers<[1], [0], [0], [1], [0, 0, 1, 1], [], []>} : vector<8x8xf32>, vector<8x8xf32>, vector<8x8xf32> -> vector<8x8xf32>
    %31 = tpu.reciprocal %29 : vector<8x1xf32> -> vector<8x1xf32>
    %32 = vector.broadcast %31 : vector<8x1xf32> to vector<8x8xf32>
    %33 = arith.mulf %30, %32 : vector<8x8xf32>
    %34 = vector.extract_strided_slice %16 {offsets = [0, 0], sizes = [8, 32], strides = [1, 1]} : vector<32x32xf32> to vector<8x32xf32>
    %cst_27 = arith.constant dense<0.000000e+00> : vector<8x32xf32>
    %35 = tpu.matmul %33, %34, %cst_27 {dimension_numbers = #tpu.dot_dimension_numbers<[1], [0], [0], [1], [0, 0, 1, 1], [], []>} : vector<8x8xf32>, vector<8x32xf32>, vector<8x32xf32> -> vector<8x32xf32>
    %36 = arith.addf %17, %35 : vector<8x32xf32>
    %37 = vector.extract_strided_slice %13 {offsets = [0, 8], sizes = [8, 8], strides = [1, 1]} : vector<8x32xf32> to vector<8x8xf32>
    %38 = vector.extract_strided_slice %7 {offsets = [0, 8], sizes = [8, 8], strides = [1, 1]} : vector<8x32xf32> to vector<8x8xf32>
    %39 = vector.extract_strided_slice %11 {offsets = [0, 8], sizes = [8, 8], strides = [1, 1]} : vector<8x32xf32> to vector<8x8xf32>
    %cst_28 = arith.constant dense<0.000000e+00> : vector<8x8xf32>
    %40 = tpu.matmul %37, %38, %cst_28 {dimension_numbers = #tpu.dot_dimension_numbers<[1], [1], [0], [0], [0, 0, 1, 0], [], []>} : vector<8x8xf32>, vector<8x8xf32>, vector<8x8xf32> -> vector<8x8xf32>
    %41 = arith.addf %40, %15 : vector<8x8xf32>
    %cst_29 = arith.constant dense<0xFF800000> : vector<8xf32>
    %42 = vector.multi_reduction <maximumf>, %41, %cst_29 [1] : vector<8x8xf32> to vector<8xf32>
    %43 = vector.shape_cast %42 : vector<8xf32> to vector<8x1xf32>
    %44 = vector.broadcast %43 : vector<8x1xf32> to vector<8x8xf32>
    %45 = arith.subf %41, %44 : vector<8x8xf32>
    %46 = math.exp %45 : vector<8x8xf32>
    %cst_30 = arith.constant dense<0.000000e+00> : vector<8xf32>
    %47 = vector.multi_reduction <add>, %46, %cst_30 [1] : vector<8x8xf32> to vector<8xf32>
    %48 = vector.shape_cast %47 : vector<8xf32> to vector<8x1xf32>
    %cst_31 = arith.constant dense<0.000000e+00> : vector<8x8xf32>
    %49 = tpu.matmul %46, %39, %cst_31 {dimension_numbers = #tpu.dot_dimension_numbers<[1], [0], [0], [1], [0, 0, 1, 1], [], []>} : vector<8x8xf32>, vector<8x8xf32>, vector<8x8xf32> -> vector<8x8xf32>
    %50 = tpu.reciprocal %48 : vector<8x1xf32> -> vector<8x1xf32>
    %51 = vector.broadcast %50 : vector<8x1xf32> to vector<8x8xf32>
    %52 = arith.mulf %49, %51 : vector<8x8xf32>
    %53 = vector.extract_strided_slice %16 {offsets = [8, 0], sizes = [8, 32], strides = [1, 1]} : vector<32x32xf32> to vector<8x32xf32>
    %cst_32 = arith.constant dense<0.000000e+00> : vector<8x32xf32>
    %54 = tpu.matmul %52, %53, %cst_32 {dimension_numbers = #tpu.dot_dimension_numbers<[1], [0], [0], [1], [0, 0, 1, 1], [], []>} : vector<8x8xf32>, vector<8x32xf32>, vector<8x32xf32> -> vector<8x32xf32>
    %55 = arith.addf %36, %54 : vector<8x32xf32>
    %56 = vector.extract_strided_slice %13 {offsets = [0, 16], sizes = [8, 8], strides = [1, 1]} : vector<8x32xf32> to vector<8x8xf32>
    %57 = vector.extract_strided_slice %7 {offsets = [0, 16], sizes = [8, 8], strides = [1, 1]} : vector<8x32xf32> to vector<8x8xf32>
    %58 = vector.extract_strided_slice %11 {offsets = [0, 16], sizes = [8, 8], strides = [1, 1]} : vector<8x32xf32> to vector<8x8xf32>
    %cst_33 = arith.constant dense<0.000000e+00> : vector<8x8xf32>
    %59 = tpu.matmul %56, %57, %cst_33 {dimension_numbers = #tpu.dot_dimension_numbers<[1], [1], [0], [0], [0, 0, 1, 0], [], []>} : vector<8x8xf32>, vector<8x8xf32>, vector<8x8xf32> -> vector<8x8xf32>
    %60 = arith.addf %59, %15 : vector<8x8xf32>
    %cst_34 = arith.constant dense<0xFF800000> : vector<8xf32>
    %61 = vector.multi_reduction <maximumf>, %60, %cst_34 [1] : vector<8x8xf32> to vector<8xf32>
    %62 = vector.shape_cast %61 : vector<8xf32> to vector<8x1xf32>
    %63 = vector.broadcast %62 : vector<8x1xf32> to vector<8x8xf32>
    %64 = arith.subf %60, %63 : vector<8x8xf32>
    %65 = math.exp %64 : vector<8x8xf32>
    %cst_35 = arith.constant dense<0.000000e+00> : vector<8xf32>
    %66 = vector.multi_reduction <add>, %65, %cst_35 [1] : vector<8x8xf32> to vector<8xf32>
    %67 = vector.shape_cast %66 : vector<8xf32> to vector<8x1xf32>
    %cst_36 = arith.constant dense<0.000000e+00> : vector<8x8xf32>
    %68 = tpu.matmul %65, %58, %cst_36 {dimension_numbers = #tpu.dot_dimension_numbers<[1], [0], [0], [1], [0, 0, 1, 1], [], []>} : vector<8x8xf32>, vector<8x8xf32>, vector<8x8xf32> -> vector<8x8xf32>
    %69 = tpu.reciprocal %67 : vector<8x1xf32> -> vector<8x1xf32>
    %70 = vector.broadcast %69 : vector<8x1xf32> to vector<8x8xf32>
    %71 = arith.mulf %68, %70 : vector<8x8xf32>
    %72 = vector.extract_strided_slice %16 {offsets = [16, 0], sizes = [8, 32], strides = [1, 1]} : vector<32x32xf32> to vector<8x32xf32>
    %cst_37 = arith.constant dense<0.000000e+00> : vector<8x32xf32>
    %73 = tpu.matmul %71, %72, %cst_37 {dimension_numbers = #tpu.dot_dimension_numbers<[1], [0], [0], [1], [0, 0, 1, 1], [], []>} : vector<8x8xf32>, vector<8x32xf32>, vector<8x32xf32> -> vector<8x32xf32>
    %74 = arith.addf %55, %73 : vector<8x32xf32>
    %75 = vector.extract_strided_slice %13 {offsets = [0, 24], sizes = [8, 8], strides = [1, 1]} : vector<8x32xf32> to vector<8x8xf32>
    %76 = vector.extract_strided_slice %7 {offsets = [0, 24], sizes = [8, 8], strides = [1, 1]} : vector<8x32xf32> to vector<8x8xf32>
    %77 = vector.extract_strided_slice %11 {offsets = [0, 24], sizes = [8, 8], strides = [1, 1]} : vector<8x32xf32> to vector<8x8xf32>
    %cst_38 = arith.constant dense<0.000000e+00> : vector<8x8xf32>
    %78 = tpu.matmul %75, %76, %cst_38 {dimension_numbers = #tpu.dot_dimension_numbers<[1], [1], [0], [0], [0, 0, 1, 0], [], []>} : vector<8x8xf32>, vector<8x8xf32>, vector<8x8xf32> -> vector<8x8xf32>
    %79 = arith.addf %78, %15 : vector<8x8xf32>
    %cst_39 = arith.constant dense<0xFF800000> : vector<8xf32>
    %80 = vector.multi_reduction <maximumf>, %79, %cst_39 [1] : vector<8x8xf32> to vector<8xf32>
    %81 = vector.shape_cast %80 : vector<8xf32> to vector<8x1xf32>
    %82 = vector.broadcast %81 : vector<8x1xf32> to vector<8x8xf32>
    %83 = arith.subf %79, %82 : vector<8x8xf32>
    %84 = math.exp %83 : vector<8x8xf32>
    %cst_40 = arith.constant dense<0.000000e+00> : vector<8xf32>
    %85 = vector.multi_reduction <add>, %84, %cst_40 [1] : vector<8x8xf32> to vector<8xf32>
    %86 = vector.shape_cast %85 : vector<8xf32> to vector<8x1xf32>
    %cst_41 = arith.constant dense<0.000000e+00> : vector<8x8xf32>
    %87 = tpu.matmul %84, %77, %cst_41 {dimension_numbers = #tpu.dot_dimension_numbers<[1], [0], [0], [1], [0, 0, 1, 1], [], []>} : vector<8x8xf32>, vector<8x8xf32>, vector<8x8xf32> -> vector<8x8xf32>
    %88 = tpu.reciprocal %86 : vector<8x1xf32> -> vector<8x1xf32>
    %89 = vector.broadcast %88 : vector<8x1xf32> to vector<8x8xf32>
    %90 = arith.mulf %87, %89 : vector<8x8xf32>
    %91 = vector.extract_strided_slice %16 {offsets = [24, 0], sizes = [8, 32], strides = [1, 1]} : vector<32x32xf32> to vector<8x32xf32>
    %cst_42 = arith.constant dense<0.000000e+00> : vector<8x32xf32>
    %92 = tpu.matmul %90, %91, %cst_42 {dimension_numbers = #tpu.dot_dimension_numbers<[1], [0], [0], [1], [0, 0, 1, 1], [], []>} : vector<8x8xf32>, vector<8x32xf32>, vector<8x32xf32> -> vector<8x32xf32>
    %93 = arith.addf %74, %92 : vector<8x32xf32>
    %c0_43 = arith.constant 0 : index
    %c0_44 = arith.constant 0 : index
    %94 = vector.load %arg10[%c0_43, %c0_44] : memref<1x32xf32, #tpu.memory_space<vmem>>, vector<1x32xf32>
    %95 = vector.broadcast %94 : vector<1x32xf32> to vector<8x32xf32>
    %96 = arith.addf %93, %95 : vector<8x32xf32>
    %c0_45 = arith.constant 0 : index
    %c0_46 = arith.constant 0 : index
    %c0_47 = arith.constant 0 : index
    %97 = vector.load %arg11[%c0_45, %c0_46, %c0_47] : memref<1x8x32xf32, #tpu.memory_space<vmem>>, vector<1x8x32xf32>
    %98 = vector.shape_cast %97 : vector<1x8x32xf32> to vector<8x32xf32>
    %99 = vector.shape_cast %96 : vector<8x32xf32> to vector<1x8x32xf32>
    tpu.vector_store %arg11[%c0_45, %c0_46, %c0_47], %99 {strides = array<i32>} : memref<1x8x32xf32, #tpu.memory_space<vmem>>, vector<1x8x32xf32>,
    return
  }
  func.func @transform_0(%arg0: i32, %arg1: i32) -> (i32, i32, i32) {
    %c0_i32 = arith.constant 0 : i32
    %c0_i32_0 = arith.constant 0 : i32
    return %arg0, %arg1, %c0_i32 : i32, i32, i32
  }
  func.func @transform_1(%arg0: i32, %arg1: i32) -> (i32, i32, i32) {
    %c0_i32 = arith.constant 0 : i32
    %c0_i32_0 = arith.constant 0 : i32
    %c0_i32_1 = arith.constant 0 : i32
    return %arg0, %c0_i32, %c0_i32_0 : i32, i32, i32
  }
  func.func @transform_2(%arg0: i32, %arg1: i32) -> (i32, i32, i32) {
    %c0_i32 = arith.constant 0 : i32
    %c0_i32_0 = arith.constant 0 : i32
    %c0_i32_1 = arith.constant 0 : i32
    return %arg0, %c0_i32, %c0_i32_0 : i32, i32, i32
  }
  func.func @transform_3(%arg0: i32, %arg1: i32) -> (i32, i32, i32) {
    %c0_i32 = arith.constant 0 : i32
    %c0_i32_0 = arith.constant 0 : i32
    return %arg0, %arg1, %c0_i32 : i32, i32, i32
  }
  func.func @transform_4(%arg0: i32, %arg1: i32) -> (i32, i32) {
    %c0_i32 = arith.constant 0 : i32
    %c0_i32_0 = arith.constant 0 : i32
    %c0_i32_1 = arith.constant 0 : i32
    return %c0_i32, %c0_i32_0 : i32, i32
  }
  func.func @transform_5(%arg0: i32, %arg1: i32) -> (i32, i32) {
    %c0_i32 = arith.constant 0 : i32
    %c0_i32_0 = arith.constant 0 : i32
    %c0_i32_1 = arith.constant 0 : i32
    return %c0_i32, %c0_i32_0 : i32, i32
  }
  func.func @transform_6(%arg0: i32, %arg1: i32) -> (i32, i32) {
    %c0_i32 = arith.constant 0 : i32
    %c0_i32_0 = arith.constant 0 : i32
    %c0_i32_1 = arith.constant 0 : i32
    return %c0_i32, %c0_i32_0 : i32, i32
  }
  func.func @transform_7(%arg0: i32, %arg1: i32) -> (i32, i32) {
    %c0_i32 = arith.constant 0 : i32
    %c0_i32_0 = arith.constant 0 : i32
    %c0_i32_1 = arith.constant 0 : i32
    return %c0_i32, %c0_i32_0 : i32, i32
  }
  func.func @transform_8(%arg0: i32, %arg1: i32) -> (i32, i32) {
    %c0_i32 = arith.constant 0 : i32
    %c0_i32_0 = arith.constant 0 : i32
    %c0_i32_1 = arith.constant 0 : i32
    return %c0_i32, %c0_i32_0 : i32, i32
  }
  func.func @transform_9(%arg0: i32, %arg1: i32) -> (i32, i32, i32) {
    %c0_i32 = arith.constant 0 : i32
    %c0_i32_0 = arith.constant 0 : i32
    return %arg0, %arg1, %c0_i32 : i32, i32, i32
  }
}

</mosaic_0001>

<bundles_post_ra>
// kernel: tpu_custom_call.1
= control target key start
LH: loop header
LB: loop body
LE: loop exit
PB: predicated region body
PF: predicated region fallthrough
CT: control target
= control target key end

     0   :  { %s3037_s0 = inlined_call_operand.hbm [shape: f32[2,8,32], index: 0, kind: input, shape index: {}]   ;;  %s3038_s1 = inlined_call_operand.hbm [shape: f32[2,8,32], index: 1, kind: input, shape index: {}]   ;;  %s3039_s2 = inlined_call_operand.hbm [shape: f32[2,8,32], index: 2, kind: input, shape index: {}]   ;;  %s3040_s3 = inlined_call_operand.hbm [shape: f32[2,8,8], index: 3, kind: input, shape index: {}]   ;;  %s3041_s4 = inlined_call_operand.hbm [shape: f32[32,32], index: 4, kind: input, shape index: {}]   ;;  %s3042_s5 = inlined_call_operand.hbm [shape: f32[32,32], index: 5, kind: input, shape index: {}]   ;;  %s3043_s6 = inlined_call_operand.hbm [shape: f32[32,32], index: 6, kind: input, shape index: {}]   ;;  %s3044_s7 = inlined_call_operand.hbm [shape: f32[32,32], index: 7, kind: input, shape index: {}]   ;;  %s3045_s8 = inlined_call_operand.vmem [shape: f32[1,32], index: 8, kind: input, shape index: {}]   ;;  %s3046_s9 = inlined_call_operand.hbm [shape: f32[2,8,32], index: 9, kind: output, shape index: {}]  }
   0x1   :  { %3062 = sst [smem:[#allocation29_spill]] %s3038_s1 }
   0x2   :  { %3063 = sst [smem:[#allocation30_spill]] %s3041_s4 }
   0x3   :  { %3064 = sst [smem:[#allocation31_spill]] %s3042_s5 }
   0x4   :  { %3065 = sst [smem:[#allocation32_spill]] %s3043_s6 }
   0x5   :  { %3066 = sst [smem:[#allocation33_spill]] %s3046_s9 }
   0x6   :  { %14 = vsyncpa [#allocation3], 0 }
   0x7   :  { %16 = vsyncpa [#allocation3 + $0x1], 0 }
   0x8   :  { %17 = vsyncpa [#allocation6], 0 }
   0x9   :  { %19 = vsyncpa [#allocation6 + $0x1], 0 }
   0xa   :  { %20 = vsyncpa [#allocation9], 0 }
   0xb   :  { %22 = vsyncpa [#allocation9 + $0x1], 0 }
   0xc   :  { %23 = vsyncpa [#allocation12], 0 }
   0xd   :  { %24 = vsyncpa [#allocation15], 0 }
   0xe   :  { %25 = vsyncpa [#allocation4], 0 }
   0xf   :  { %27 = vsyncpa [#allocation4 + $0x1], 0  ;;  %s2642_s30 = smov 0   ;;  %s2644_s10 = smov 0  }
  0x10   :  { %s2646_s11 = smov 0   ;;  %s2648_s12 = smov 0  }
  0x11   :  { %s2650_s13 = smov 0   ;;  %s2652_s14 = smov 0  }
  0x12 LB: > { %3067 = sst [smem:[#allocation24_spill]] %s2554_s30  ;;  %s2673_s15 = sadd.s32 4294967295, %s2574_s14   ;;  %s2574_s14 = sphi %s2652_s14, %s33_s14   ;;  %s2570_s13 = sphi %s2650_s13, %s3105_s13   ;;  %s2566_s12 = sphi %s2648_s12, %s3104_s12   ;;  %s2562_s11 = sphi %s2646_s11, %s3108_s11   ;;  %s2558_s10 = sphi %s2644_s10, %s3107_s10   ;;  %s2554_s30 = sphi %s2642_s30, %s3106_s30  }
  0x13   : > { %3068 = sst [smem:[#allocation25_spill]] %s2570_s13  ;;  %s1936_s16 = sadd.s32 4294967294, %s2574_s14  }
  0x14   : > { %p67_p0 = scmp.ne.s32.totalorder %s2558_s10, %s2554_s30  ;;  %p3047_p1 = scmp.eq.s32.totalorder %s2673_s15, 0 }
  0x15   : > { %p278_p2 = scmp.eq.s32.totalorder %s2673_s15, 1  ;;  %p284_p3 = scmp.eq.s32.totalorder %s1936_s16, 1 }
  0x16   : > { %p2682_p4 = por %p3047_p1, %p67_p0  ;;  %p1937_p5 = scmp.ge.s32.totalorder %s2574_s14, 1 }
  0x17   : > { %p2687_p6 = por %p284_p3, %p67_p0  ;;  %p291_p7 = scmp.lt.s32.totalorder %s2574_s14, 3 }
  0x18   : > { %s2576_s20 = smov [#allocation10]   ;;  %s2577_s23 = smov [#allocation11]  }
  0x19   : > { %s3070_s18 = scalar_select %p2687_p6, 1, 0 }
  0x1a   : > { %p2692_p8 = pnand %p1937_p5, %p291_p7  ;;  %s303_s21 = sshll.u32 %s2576_s20, 4  ;;  %s304_s21 = int_to_ptr.vmem [resolvable:$true] %s303_s21 }
  0x1b   : > { %3071 = sst [smem:[#allocation26_spill]] %s3070_s18  ;;  %s316_s24 = sshll.u32 %s2577_s23, 4  ;;  %s317_s24 = int_to_ptr.vmem [resolvable:$true] %s316_s24 }
  0x1c   : > { %p2143_p9 = pneg %p2692_p8  ;;  %s2269_s25 = scalar_lea.vmem %s304_s21, 512 }
  0x1d   : > { %p2270_p13 = scmp.ne.s32.totalorder %s304_s21, %s2269_s25  ;;  %p2277_p5 = scmp.lt.s32.totalorder %s304_s21, %s304_s21 }
  0x1e   : > { %p2701_p11 = pnand %p2143_p9, %p3047_p1  ;;  %p2278_p7 = scmp.lt.s32.totalorder %s2269_s25, %s2269_s25 }
  0x20   : > { %p3057_p12 = pneg %p2701_p11  ;;  %p2279_p10 = por %p2278_p7, %p2277_p5 }
  0x22   : > { %p2272_p0 = pnand %p2270_p13, %p3057_p12 }
  0x24   : > { %p2273_p3 = pneg %p2272_p0 }
  0x26   : > { %p2280_p9 = pnand %p2279_p10, %p2273_p3 }
  0x28   : > { %2283 = shalt.err (!%p2280_p9)
}
  0x29   : > { %s3048_s26 = smov 128   ;;  %s3050_s27 = smov 8  }
  0x2a   : > { %s3074_s4 = sld [smem:[#allocation30_spill]]  ;;  %s2295_s16 = scalar_lea.vmem %s317_s24, 512 }
  0x2b   : > { %p2296_p13 = scmp.ne.s32.totalorder %s317_s24, %s2295_s16  ;;  %p2303_p10 = scmp.lt.s32.totalorder %s317_s24, %s317_s24 }
  0x2c   : > { %p2304_p3 = scmp.lt.s32.totalorder %s2295_s16, %s2295_s16 }
  0x2d   : > { %p2298_p0 = pnand %p2296_p13, %p3057_p12 }
  0x2e   : > { %p2305_p7 = por %p2304_p3, %p2303_p10 }
  0x2f   : > { %p2299_p5 = pneg %p2298_p0 }
  0x30   : > { %2146 = dma.hbm_to_vmem [thread:$0]  (!%p2701_p11), %s3074_s4, 512, %s304_s21, [#allocation9], %s3048_s26, %s3048_s26, %s3050_s27  }
  0x31   : > { %p2306_p9 = pnand %p2305_p7, %p2299_p5 }
  0x33   : > { %2309 = shalt.err (!%p2306_p9)
}
  0x34   : > { %s3075_s5 = sld [smem:[#allocation31_spill]]  ;;  %s45_s21 = sadd.s32 1, %s2570_s13 }
  0x35   : > { %s54_s25 = sadd.s32 1, %s2562_s11  ;;  %p47_p13 = scmp.ge.s32.totalorder %s45_s21, 2 }
  0x36   : > { %p61_p0 = scmp.ne.s32.totalorder %s2562_s11, %s2558_s10  ;;  %p62_p5 = scmp.eq.s32.totalorder %s2574_s14, 0 }
  0x37   : > { %p2177_p10 = scmp.lt.s32.totalorder %s2574_s14, 2  ;;  %s3110_s21 = smov (%p47_p13, %s45_s21), 0 }
  0x38   : > { %3076 = sst [smem:[#allocation27_spill]] %s3110_s21  ;;  %p63_p3 = por %p62_p5, %p61_p0 }
  0x39   : > { %p2739_p7 = por %p278_p2, %p61_p0  ;;  %s49_s29 = ssub.s32 %s2570_s13, %s3110_s21 }
  0x3a   : > { %2149 = dma.hbm_to_vmem [thread:$0]  (!%p2701_p11), %s3075_s5, 512, %s317_s24, [#allocation12], %s3048_s26, %s3048_s26, %s3050_s27  }
  0x3b   : > { %s3077_s28 = scalar_select %p2739_p7, 1, 0 }
  0x3c   : > { %s3053_s24 = sand.u32 1, %s2562_s11   ;;  %p52_p9 = scmp.eq.s32.totalorder %s49_s29, 0 }
  0x3d   : > { %s2748_s16 = sshll.u32 %s3053_s24, 3  ;;  %s2751_s20 = sshll.u32 %s2570_s13, 7 }
  0x3e   : > { %p2753_p1 = pnand %p2177_p10, %p63_p3  ;;  %s3058_s27 = sand.u32 1, %s2574_s14  }
  0x3f   : > { %s2758_s26 = scalar_select %p52_p9, %s2562_s11, %s54_s25  }
  0x40   : > { %s3080_s1 = sld [smem:[#allocation29_spill]]  ;;  %s382_s21 = scalar_lea.vmem [#allocation5], %s2748_s16 }
  0x41   : > { %3079 = sst [smem:[#allocation28_spill]] %s2758_s26  ;;  %s389_s24 = sshll.u32 %s382_s21, 4  ;;  %s390_s24 = int_to_ptr.vmem [resolvable:$true] %s389_s24 }
  0x42   : > { %s2768_s13 = scalar_lea.sflag [#allocation6], %s3058_s27  ;;  %p3059_p2 = pneg %p2753_p1 }
  0x43   : > { %s2323_s18 = scalar_lea.vmem %s390_s24, 128  ;;  %s2580_s25 = smov [#allocation5]  }
  0x44   : > { %p2324_p13 = scmp.ne.s32.totalorder %s390_s24, %s2323_s18  ;;  %s2328_s26 = sshll.u32 %s2580_s25, 4  ;;  %s2329_s26 = int_to_ptr.vmem [resolvable:$false] %s2328_s26 }
  0x45   : > { %s2330_s30 = scalar_lea.vmem %s2329_s26, 256  ;;  %p2331_p10 = scmp.lt.s32.totalorder %s390_s24, %s2329_s26 }
  0x46   : > { %s387_s29 = scalar_lea.hbm %s3080_s1, %s2751_s20  ;;  %p2326_p0 = pnand %p2324_p13, %p3059_p2 }
  0x47   : > { %p2332_p3 = scmp.lt.s32.totalorder %s2330_s30, %s2323_s18 }
  0x48   : > { %p2327_p5 = pneg %p2326_p0 }
  0x49   : > { %p2333_p9 = por %p2332_p3, %p2331_p10 }
  0x4b   : > { %p2334_p12 = pnand %p2333_p9, %p2327_p5 }
  0x4d   : > { %2337 = shalt.err (!%p2334_p12)
}
  0x4e   : > { %2162 = dma.hbm_to_vmem [thread:$0]  (!%p2753_p1), %s387_s29, 128, %s390_s24, %s2768_s13  }
  0x4f   : > { %s2581_s4 = smov [#allocation13]   ;;  %s2582_s21 = smov [#allocation14]  }
  0x50   : > { %s329_s5 = sshll.u32 %s2581_s4, 4  ;;  %s342_s27 = sshll.u32 %s2582_s21, 4  ;;  %s330_s5 = int_to_ptr.vmem [resolvable:$true] %s329_s5  ;;  %s343_s27 = int_to_ptr.vmem [resolvable:$true] %s342_s27 }
  0x51   : > { %s2349_s1 = scalar_lea.vmem %s330_s5, 512  ;;  %p3081_p0 = pneg %p2701_p11 }
  0x52   : > { %p2350_p13 = scmp.ne.s32.totalorder %s330_s5, %s2349_s1  ;;  %p2357_p10 = scmp.lt.s32.totalorder %s330_s5, %s330_s5 }
  0x53   : > { %p2358_p5 = scmp.lt.s32.totalorder %s2349_s1, %s2349_s1 }
  0x54   : > { %p2352_p2 = pnand %p2350_p13, %p3081_p0 }
  0x55   : > { %p2359_p12 = por %p2358_p5, %p2357_p10 }
  0x56   : > { %p2353_p6 = pneg %p2352_p2 }
  0x58   : > { %p2360_p3 = pnand %p2359_p12, %p2353_p6 }
  0x5a   : > { %2363 = shalt.err (!%p2360_p3)
}
  0x5b   : > { %s3082_s30 = smov 8   ;;  %s3083_s18 = smov 128  }
  0x5c   : > { %s3084_s6 = sld [smem:[#allocation32_spill]]  ;;  %s2375_s29 = scalar_lea.vmem %s343_s27, 512 }
  0x5d   : > { %p2376_p9 = scmp.ne.s32.totalorder %s343_s27, %s2375_s29  ;;  %p3085_p13 = pmov %p3081_p0 }
  0x5e   : > { %p2383_p7 = scmp.lt.s32.totalorder %s343_s27, %s343_s27  ;;  %p2384_p10 = scmp.lt.s32.totalorder %s2375_s29, %s2375_s29 }
  0x5f   : > { %p2378_p2 = pnand %p2376_p9, %p3085_p13 }
  0x60   : > { %p2385_p6 = por %p2384_p10, %p2383_p7 }
  0x61   : > { %p2379_p0 = pneg %p2378_p2 }
  0x62   : > { %2152 = dma.hbm_to_vmem [thread:$0]  (!%p2701_p11), %s3084_s6, 512, %s330_s5, [#allocation12], %s3083_s18, %s3083_s18, %s3082_s30  }
  0x63   : > { %p2386_p5 = pnand %p2385_p6, %p2379_p0 }
  0x65   : > { %2389 = shalt.err (!%p2386_p5)
}
  0x66   : > { %2155 = dma.hbm_to_vmem [thread:$0]  (!%p2701_p11), %s3044_s7, 512, %s343_s27, [#allocation15], %s3083_s18, %s3083_s18, %s3082_s30  }
  0x67   : > { %s369_s21 = scalar_lea.hbm %s3037_s0, %s2751_s20  ;;  %s363_s26 = scalar_lea.vmem [#allocation2], %s2748_s16 }
  0x68   : > { %s371_s24 = sshll.u32 %s363_s26, 4  ;;  %s3086_s29 = sand.u32 1, %s2562_s11   ;;  %s372_s24 = int_to_ptr.vmem [resolvable:$true] %s371_s24 }
  0x69   : > { %s360_s22 = scalar_lea.sflag [#allocation3], %s3086_s29  ;;  %s2403_s6 = scalar_lea.vmem %s372_s24, 128 }
  0x6a   : > { %p2404_p7 = scmp.ne.s32.totalorder %s372_s24, %s2403_s6  ;;  %p3087_p12 = pneg %p2753_p1 }
  0x6b   : > { %s2583_s1 = smov [#allocation2]  }
  0x6c   : > { %p2406_p3 = pnand %p2404_p7, %p3087_p12  ;;  %s2408_s25 = sshll.u32 %s2583_s1, 4  ;;  %s2409_s25 = int_to_ptr.vmem [resolvable:$false] %s2408_s25 }
  0x6d   : > { %s2410_s9 = scalar_lea.vmem %s2409_s25, 256  ;;  %p2411_p11 = scmp.lt.s32.totalorder %s372_s24, %s2409_s25 }
  0x6e   : > { %p2407_p9 = pneg %p2406_p3  ;;  %p2412_p13 = scmp.lt.s32.totalorder %s2410_s9, %s2403_s6 }
  0x70   : > { %p2413_p2 = por %p2412_p13, %p2411_p11 }
  0x72   : > { %p2414_p0 = pnand %p2413_p2, %p2407_p9 }
  0x74   : > { %2417 = shalt.err (!%p2414_p0)
}
  0x75   : > { %2159 = dma.hbm_to_vmem [thread:$0]  (!%p2753_p1), %s369_s21, 128, %s372_s24, %s360_s22  }
  0x76   : > { %s405_s18 = scalar_lea.hbm %s3039_s2, %s2751_s20  ;;  %s400_s4 = scalar_lea.vmem [#allocation7], %s2748_s16 }
  0x77   : > { %s407_s5 = sshll.u32 %s400_s4, 4  ;;  %p3088_p6 = pmov %p3087_p12  ;;  %s408_s5 = int_to_ptr.vmem [resolvable:$true] %s407_s5 }
  0x78   : > { %s2431_s26 = scalar_lea.vmem %s408_s5, 128  ;;  %s2584_s6 = smov [#allocation7]  }
  0x79   : > { %p2432_p10 = scmp.ne.s32.totalorder %s408_s5, %s2431_s26  ;;  %s2436_s9 = sshll.u32 %s2584_s6, 4  ;;  %s2437_s9 = int_to_ptr.vmem [resolvable:$false] %s2436_s9 }
  0x7a   : > { %s2438_s29 = scalar_lea.vmem %s2437_s9, 256  ;;  %p2439_p12 = scmp.lt.s32.totalorder %s408_s5, %s2437_s9 }
  0x7b   : > { %p2434_p5 = pnand %p2432_p10, %p3088_p6  ;;  %p2440_p3 = scmp.lt.s32.totalorder %s2438_s29, %s2431_s26 }
  0x7d   : > { %p2435_p7 = pneg %p2434_p5  ;;  %p2441_p9 = por %p2440_p3, %p2439_p12 }
  0x7f   : > { %p2442_p11 = pnand %p2441_p9, %p2435_p7 }
  0x81   : > { %2445 = shalt.err (!%p2442_p11)
}
  0x82   : > { %2165 = dma.hbm_to_vmem [thread:$0]  (!%p2753_p1), %s405_s18, 128, %s408_s5, %s2768_s13  }
  0x83   : > { %s424_s22 = scalar_lea.hbm %s3040_s3, %s2751_s20  ;;  %s418_s1 = scalar_lea.vmem [#allocation8], %s2748_s16 }
  0x84   : > { %s426_s25 = sshll.u32 %s418_s1, 4  ;;  %s3089_s27 = sand.u32 1, %s2574_s14   ;;  %s427_s25 = int_to_ptr.vmem [resolvable:$true] %s426_s25 }
  0x85   : > { %s415_s30 = scalar_lea.sflag [#allocation9], %s3089_s27  ;;  %s2459_s4 = scalar_lea.vmem %s427_s25, 128 }
  0x86   : > { %p2460_p13 = scmp.ne.s32.totalorder %s427_s25, %s2459_s4  ;;  %p3090_p2 = pmov %p3088_p6 }
  0x87   : > { %s2585_s26 = smov [#allocation8]  }
  0x88   : > { %p2462_p0 = pnand %p2460_p13, %p3090_p2  ;;  %s2464_s6 = sshll.u32 %s2585_s26, 4  ;;  %s2465_s6 = int_to_ptr.vmem [resolvable:$false] %s2464_s6 }
  0x89   : > { %s2466_s9 = scalar_lea.vmem %s2465_s6, 256  ;;  %p2467_p6 = scmp.lt.s32.totalorder %s427_s25, %s2465_s6 }
  0x8a   : > { %p2463_p10 = pneg %p2462_p0  ;;  %p2468_p5 = scmp.lt.s32.totalorder %s2466_s9, %s2459_s4 }
  0x8c   : > { %p2469_p7 = por %p2468_p5, %p2467_p6 }
  0x8e   : > { %p2470_p12 = pnand %p2469_p7, %p2463_p10 }
  0x90   : > { %2473 = shalt.err (!%p2470_p12)
}
  0x91   : > { %2168 = dma.hbm_to_vmem [thread:$0]  (!%p2753_p1), %s424_s22, 128, %s427_s25, %s415_s30  }
  0x92   : > { %435 = sbr.rel (%p2692_p8) target bundleno = 2153 (0x869), region = 56  ;;  %s2838_s13 = sand.u32 (!%p2692_p8), 1, %s2558_s10  }
  0x93   : > { %s2841_s16 = sshll.u32 (!%p2692_p8), %s2838_s13, 3  ;;  %s438_s20 = scalar_lea.sflag (!%p2692_p8), [#allocation3], %s2838_s13 }
  0x94   : > { %s441_s18 = scalar_lea.vmem (!%p2692_p8), [#allocation2], %s2841_s16 }
  0x97   : > { %2525 = dma.done.wait (%p2682_p4), %s438_s20, 128  }
  0x98   : > { %2527 = vsyncadd (%p2682_p4), %s438_s20, 4294967168  ;;  %s446_s19 = sand.u32 1, %s2673_s15   ;;  %s450_s5 = scalar_lea.vmem [#allocation5], %s2841_s16 }
  0x99   : > { %s447_s23 = scalar_lea.sflag [#allocation6], %s446_s19 }
  0x9a   : > { %2529 = dma.done.wait (%p2682_p4), %s447_s23, 256  }
  0x9b   : > { %2531 = vsyncadd (%p2682_p4), %s447_s23, 4294967040  ;;  %s459_s29 = scalar_lea.vmem [#allocation7], %s2841_s16  ;;  %s465_s21 = scalar_lea.sflag [#allocation9], %s446_s19 }
  0x9c   : > { %s468_s24 = scalar_lea.vmem [#allocation8], %s2841_s16 }
  0x9d   : > { %2533 = dma.done.wait (%p2682_p4), %s465_s21, 128  }
  0x9e   : > { %2535 = vsyncadd (%p2682_p4), %s465_s21, 4294967168  ;;  %p3091_p1 = scmp.eq.s32.totalorder %s2673_s15, 0 }
  0xa0   : > { %2537 = dma.done.wait (%p3091_p1), [#allocation9], 512   ;;  %p3092_p8 = pmov %p3091_p1 }
  0xa1   : > { %p3093_p3 = pmov %p3091_p1 }
  0xa2   : > { %2539 = vsyncadd (%p3092_p8), [#allocation9], 4294966784 }
  0xa3   : > { %2541 = dma.done.wait (%p3093_p3), [#allocation12], 1024   ;;  %p3094_p9 = pmov %p3091_p1 }
  0xa4   : > { %p3095_p11 = pmov %p3091_p1 }
  0xa5   : > { %2543 = vsyncadd (%p3094_p9), [#allocation12], 4294966272 }
  0xa6   : > { %2545 = dma.done.wait (%p3095_p11), [#allocation15], 512   ;;  %p3096_p13 = pmov %p3091_p1 }
  0xa7   : > { %v2586_v0 = vmov 0.0   ;;  %vm2587_vm0 = vmmov 0   ;;  %v538_v1 = vld [vmem:[#allocation10 + $0x18] sm:$0xff]  ;;  %v537_v3 = vld [vmem:[#allocation10 + $0x10] sm:$0xff]  ;;  %v536_v5 = vld [vmem:[#allocation10 + $0x8] sm:$0xff]  ;;  %vm539_vm1 = vcmask 261120  }
  0xa8   : > { %2547 = vsyncadd (%p3096_p13), [#allocation15], 4294966784  ;;  %2024 = vmatprep.subr.mxu0 %v2586_v0  ;;  %2035 = vmatprep.subr.mxu1 %v2586_v0  ;;  %v617_v2 = vld [vmem:[#allocation11 + $0x18] sm:$0xff]  ;;  %v616_v4 = vld [vmem:[#allocation11 + $0x10] sm:$0xff]  ;;  %vm775_vm2 = vcmask 64512   ;;  %s2588_s15 = smov 120  }
  0xa9   : > { %2032 = vmatprep.mubr.msk.f32.mxu0 %vm2587_vm0, %v2586_v0  ;;  %2043 = vmatprep.mubr.msk.f32.mxu1 %vm2587_vm0, %v2586_v0  ;;  %v615_v6 = vld [vmem:[#allocation11 + $0x8] sm:$0xff]  ;;  %v535_v7 = vld [vmem:[#allocation10] sm:$0xff]  ;;  %v613_v10 = vld [vmem:[%s450_s5] sm:$0xff]  ;;  %s2589_s17 = smov 112   ;;  %s2590_s22 = smov 104  }
  0xaa   : > { %2025 = vmatpush3.msra.mxu0 %v538_v1  ;;  %2036 = vmatpush3.msra.mxu1 %v617_v2  ;;  %v614_v8 = vld [vmem:[#allocation11] sm:$0xff]  ;;  %v695_v11 = vld [vmem:[#allocation13 + $0x18] sm:$0xff]  ;;  %v694_v12 = vld [vmem:[#allocation13 + $0x10] sm:$0xff]  ;;  %s1982_s27 = sshll.u32 %s2566_s12, 7  ;;  %s533_s30 = scalar_lea.vmem [#allocation16], %s2841_s16 }
  0xab   : > { %2026 = vmatprep.subr.mxu0 %v2586_v0  ;;  %2037 = vmatprep.subr.mxu1 %v2586_v0  ;;  %v534_v9 = vld [vmem:[%s441_s18] sm:$0xff]  ;;  %v2933_v25 = vld [vmem:[%s468_s24] sm:$0xff]  ;;  %s1750_s4 = sshll.u32 %s533_s30, 4  ;;  %s3097_s9 = sld [smem:[#allocation33_spill]]  ;;  %s1751_s4 = int_to_ptr.vmem [resolvable:$true] %s1750_s4 }
  0xac   : > { %2027 = vmatpush3.msra.mxu0 %v537_v3  ;;  %2038 = vmatpush3.msra.mxu1 %v616_v4  ;;  %v693_v13 = vld [vmem:[#allocation13 + $0x8] sm:$0xff]  ;;  %v692_v14 = vld [vmem:[#allocation13] sm:$0xff]  ;;  %s1736_s18 = scalar_lea.sflag [#allocation4], %s2838_s13  ;;  %s2474_s19 = scalar_lea.vmem %s1751_s4, 128 }
  0xad   : > { %2028 = vmatprep.subr.mxu0 %v2586_v0  ;;  %2039 = vmatprep.subr.mxu1 %v2586_v0  ;;  %v691_v15 = vld [vmem:[%s459_s29] sm:$0xff]  ;;  %p2475_p4 = scmp.ne.s32.totalorder %s1751_s4, %s2474_s19  ;;  %p3098_p2 = scmp.ne.s32.totalorder %s3077_s28, 0 }
  0xae   : > { %2029 = vmatpush3.msra.mxu0 %v536_v5  ;;  %2040 = vmatpush3.msra.mxu1 %v615_v6  ;;  %v771_v43 = vld [vmem:[#allocation14] sm:$0xff]  ;;  %v772_v46 = vld [vmem:[#allocation14 + $0x8] sm:$0xff]  ;;  %s2591_s23 = smov [#allocation16]  }
  0xaf   : > { %2030 = vmatprep.subr.mxu0 %v2586_v0  ;;  %2041 = vmatprep.subr.mxu1 %v2586_v0  ;;  %p2476_p0 = pnand %p2475_p4, %p3098_p2  ;;  %s2478_s12 = sshll.u32 %s2591_s23, 4  ;;  %s2479_s12 = int_to_ptr.vmem [resolvable:$false] %s2478_s12 }
  0xb0   : > { %2031 = vmatpush3.msra.mxu0 %v535_v7  ;;  %2042 = vmatpush3.msra.mxu1 %v614_v8  ;;  %s2480_s16 = scalar_lea.vmem %s2479_s12, 256  ;;  %p2481_p6 = scmp.lt.s32.totalorder %s1751_s4, %s2479_s12 }
  0xb1   : > { %2033 = vmatmul.mubr.msk.f32.vlgmr.msra.gmra.mxu0 %vm539_vm1, %v534_v9  ;;  %2044 = vmatmul.mubr.msk.f32.vlgmr.msra.gmra.mxu1 %vm539_vm1, %v613_v10  ;;  %s1748_s20 = scalar_lea.hbm %s3097_s9, %s1982_s27  ;;  %p2477_p10 = pneg %p2476_p0 }
  0xb2   : > { %2046 = vmatprep.subr.mxu0 %v2586_v0  ;;  %2054 = vmatprep.mubr.msk.f32.mxu0 %vm2587_vm0, %v2586_v0  ;;  %p2482_p5 = scmp.lt.s32.totalorder %s2480_s16, %s2474_s19 }
  0xb3   : > { %2047 = vmatpush3.msra.mxu0 %v695_v11  ;;  %2057 = vmatprep.subr.mxu1 %v2586_v0 }
  0xb4   : > { %2048 = vmatprep.subr.mxu0 %v2586_v0  ;;  %2059 = vmatprep.mubr.msk.f32.mxu1 %vm2587_vm0, %v2586_v0  ;;  %p2483_p7 = por %p2482_p5, %p2481_p6 }
  0xb5   : > { %2049 = vmatpush3.msra.mxu0 %v694_v12  ;;  %v773_v12 = vld [vmem:[#allocation14 + $0x10] sm:$0xff] }
  0xb6   : > { %2050 = vmatprep.subr.mxu0 %v2586_v0  ;;  %p2484_p12 = pnand %p2483_p7, %p2477_p10 }
  0xb7   : > { %2051 = vmatpush3.msra.mxu0 %v693_v13 }
  0xb8   : > { %2052 = vmatprep.subr.mxu0 %v2586_v0 }
  0xb9   : > { %2053 = vmatpush3.msra.mxu0 %v692_v14 }
  0xba   : > { %2055 = vmatmul.mubr.msk.f32.vlgmr.msra.gmra.mxu0 %vm539_vm1, %v691_v15  ;;  %2067 = vmatprep.subr.mxu0 %v2586_v0 }
  0xbb   : > { %2069 = vmatprep.mubr.msk.f32.mxu0 %vm2587_vm0, %v2586_v0 }
 0x171   : > { %v609_v16 = vpop.f32.mrf.mxu0  ;;  %v2906_v17 = vpop.f32.mrf.mxu1 }
 0x172   : > { %v2908_v18 = vmul.f32 0.17677669, %v609_v16  ;;  %938 = vrot.lane.b32.xlu0 %v2906_v17, %s2588_s15  ;;  %2058 = vmatpush3.xpose.msk.msra.mxu1 %vm775_vm2, %v2906_v17 }
 0x173   : > { %v2034_v19 = vpop.f32.mrf.mxu0  ;;  %v2045_v20 = vpop.f32.mrf.mxu1  ;;  %2062 = vmatprep.subr.mxu1 %v2586_v0 }
 0x175   : > { %2060 = vmatmul.mubr.msk.f32.vlgmr.msra.gmra.mxu1 %vm775_vm2, %v2908_v18 }
 0x176   : > { %936 = vrot.lane.b32.xlu0 %v2908_v18, %s2588_s15  ;;  %2064 = vmatprep.mubr.msk.f32.mxu1 %vm2587_vm0, %v2586_v0 }
 0x17a   : > { %v2919_v21 = vpop.f32.mrf.mxu0 }
 0x17b   : > { %1024 = vrot.lane.b32.xlu0 %v2919_v21, %s2588_s15  ;;  %2063 = vmatpush3.msra.mxu1 %v2919_v21 }
 0x17c   : > { %v2056_v22 = vpop.f32.mrf.mxu0  ;;  %2072 = vmatprep.subr.mxu1 %v2586_v0 }
 0x17f   : > { %1250 = vrot.lane.b32.xlu0 %v2906_v17, %s2589_s17 }
 0x1e4   : > { %v939_v23 = vpop.permute.xlu0 %938 }
 0x1e5   : > { %2068 = vmatpush3.xpose.msk.msra.mxu0 %vm775_vm2, %v939_v23 }
 0x1e6   : > { %2077 = vmatprep.subr.mxu0 %v2586_v0 }
 0x1e8   : > { %v937_v24 = vpop.permute.xlu0 %936 }
 0x1e9   : > { %2070 = vmatmul.mubr.msk.f32.vlgmr.msra.gmra.mxu0 %vm775_vm2, %v937_v24 }
 0x1ea   : > { %2079 = vmatprep.mubr.msk.f32.mxu0 %vm2587_vm0, %v2586_v0  ;;  %2078 = vmatpush3.msra.mxu0 %v772_v46 }
 0x1eb   : > { %2087 = vmatprep.subr.mxu0 %v2586_v0 }
 0x1ed   : > { %v1025_v38 = vpop.permute.xlu0 %1024 }
 0x1f1   : > { %v1251_v47 = vpop.permute.xlu0 %1250 }
 0x235   : > { %v848_v26 = vpop.f32.mrf.mxu1 }
 0x236   : > { %v849_v27 = vadd.f32 %v848_v26, %v2933_v25 }
 0x237   : > { %v2061_v28 = vpop.f32.mrf.mxu1 }
 0x238   : > { %v852_v29 = vsel %vm775_vm2, %v849_v27, -inf }
 0x239   : > { %853 = vmax.xlane.f32.xlu1 %v852_v29  ;;  %v774_v29 = vld [vmem:[#allocation14 + $0x18] sm:$0xff] }
 0x2a9   : > { %v1010_v30 = vpop.f32.mrf.mxu0 }
 0x2aa   : > { %v1011_v31 = vadd.f32 %v1010_v30, %v2933_v25 }
 0x2ab   : > { %v2071_v32 = vpop.f32.mrf.mxu0 }
 0x2ac   : > { %v1014_v33 = vsel %vm775_vm2, %v1011_v31, -inf }
 0x2ad   : > { %1015 = vmax.xlane.f32.xlu1 %v1014_v33 }
 0x2c2   : > { %v854_v34 = vpop.xlane.xlu1 %853 }
 0x2c3   : > { %v855_v35 = vsub.f32 %v849_v27, %v854_v34 }
 0x2c5   : > { %v856_v36 = vmul.f32 1.442695, %v855_v35 }
 0x2c7   : > { %2242 = vpow2.f32 %v856_v36 }
 0x2d4   : > { %v2243_v37 = vpop.eup %2242 }
 0x2d5   : > { %2065 = vmatmul.mubr.msk.f32.vlgmr.msra.gmra.mxu1 %vm775_vm2, %v2243_v37  ;;  %v858_v39 = vsel %vm775_vm2, %v2243_v37, 0.0 }
 0x2d6   : > { %859 = vadd.xlane.f32.xlu0 %v858_v39  ;;  %2073 = vmatpush3.msra.mxu1 %v1025_v38  ;;  %v1980_v38 = vld [vmem:[%s3045_s8] ss:$0 sm:$0xff] }
 0x2d7   : > { %2074 = vmatprep.mubr.msk.f32.mxu1 %vm2587_vm0, %v2586_v0  ;;  %2082 = vmatprep.subr.mxu1 %v2586_v0 }
 0x2ec   : > { %1335 = vrot.lane.b32.xlu0 %v2919_v21, %s2589_s17 }
 0x2f0   : > { %1487 = vrot.lane.b32.xlu0 %v2908_v18, %s2590_s22 }
 0x336   : > { %v1016_v40 = vpop.xlane.xlu1 %1015 }
 0x337   : > { %v1017_v41 = vsub.f32 %v1011_v31, %v1016_v40 }
 0x339   : > { %v1018_v42 = vmul.f32 1.442695, %v1017_v41 }
 0x33b   : > { %2244 = vpow2.f32 %v1018_v42 }
 0x348   : > { %v2245_v44 = vpop.eup %2244 }
 0x349   : > { %2075 = vmatmul.mubr.msk.f32.vlgmr.msra.gmra.mxu1 %vm775_vm2, %v2245_v44  ;;  %v1020_v45 = vsel %vm775_vm2, %v2245_v44, 0.0 }
 0x34a   : > { %1021 = vadd.xlane.f32.xlu1 %v1020_v45  ;;  %2083 = vmatpush3.msra.mxu1 %v771_v43 }
 0x34b   : > { %2084 = vmatprep.mubr.msk.f32.mxu1 %vm2587_vm0, %v2586_v0  ;;  %2092 = vmatprep.subr.mxu1 %v2586_v0 }
 0x35b   : > { %1248 = vrot.lane.b32.xlu1 %v2908_v18, %s2589_s17 }
 0x35f   : > { %v860_v48 = vpop.xlane.xlu0 %859 }
 0x360   : > { %2246 = vrcp.f32 %v860_v48 }
 0x363   : > { %v1336_v53 = vpop.permute.xlu0 %1335 }
 0x367   : > { %v1488_v11 = vpop.permute.xlu0 %1487 }
 0x36d   : > { %v2247_v49 = vpop.eup %2246 }
 0x395   : > { %v930_v50 = vpop.f32.mrf.mxu1 }
 0x396   : > { %v935_v51 = vmul.f32 %v2247_v49, %v930_v50 }
 0x397   : > { %v2066_v52 = vpop.f32.mrf.mxu1 }
 0x398   : > { %2085 = vmatmul.mubr.msk.f32.vlgmr.msra.gmra.mxu1 %vm775_vm2, %v935_v51 }
 0x399   : > { %2093 = vmatpush3.msra.mxu1 %v1336_v53  ;;  %2094 = vmatprep.mubr.msk.f32.mxu1 %vm2587_vm0, %v2586_v0 }
 0x39a   : > { %2102 = vmatprep.subr.mxu1 %v2586_v0 }
 0x3d3   : > { %v1022_v54 = vpop.xlane.xlu1 %1021 }
 0x3d4   : > { %2248 = vrcp.f32 %v1022_v54 }
 0x3d7   : > { %v1249_v59 = vpop.permute.xlu1 %1248 }
 0x3e1   : > { %v2249_v55 = vpop.eup %2248 }
 0x409   : > { %v1096_v56 = vpop.f32.mrf.mxu1 }
 0x40a   : > { %v1101_v57 = vmul.f32 %v2249_v55, %v1096_v56 }
 0x40b   : > { %v2076_v58 = vpop.f32.mrf.mxu1 }
 0x40c   : > { %2080 = vmatmul.mubr.msk.f32.vlgmr.msra.gmra.mxu0 %vm775_vm2, %v1101_v57 }
 0x40d   : > { %2088 = vmatpush3.xpose.msk.msra.mxu0 %vm775_vm2, %v1251_v47  ;;  %2089 = vmatprep.mubr.msk.f32.mxu0 %vm2587_vm0, %v2586_v0 }
 0x40e   : > { %2097 = vmatprep.subr.mxu0 %v2586_v0 }
 0x410   : > { %2090 = vmatmul.mubr.msk.f32.vlgmr.msra.gmra.mxu0 %vm775_vm2, %v1249_v59 }
 0x411   : > { %2099 = vmatprep.mubr.msk.f32.mxu0 %vm2587_vm0, %v2586_v0  ;;  %2098 = vmatpush3.msra.mxu0 %v773_v12 }
 0x412   : > { %2107 = vmatprep.subr.mxu0 %v2586_v0 }
 0x458   : > { %v1244_v60 = vpop.f32.mrf.mxu1 }
 0x45a   : > { %v2086_v61 = vpop.f32.mrf.mxu1 }
 0x4cc   : > { %v1171_v62 = vpop.f32.mrf.mxu0 }
 0x4ce   : > { %v2081_v63 = vpop.f32.mrf.mxu0 }
 0x4d0   : > { %v1322_v1 = vpop.f32.mrf.mxu0 }
 0x4d1   : > { %v1323_v2 = vadd.f32 %v1322_v1, %v2933_v25 }
 0x4d2   : > { %v2091_v3 = vpop.f32.mrf.mxu0 }
 0x4d3   : > { %v1326_v4 = vsel %vm775_vm2, %v1323_v2, -inf }
 0x4d4   : > { %1327 = vmax.xlane.f32.xlu1 %v1326_v4 }
 0x4e5   : > { %1489 = vrot.lane.b32.xlu1 %v2906_v17, %s2590_s22 }
 0x55d   : > { %v1328_v5 = vpop.xlane.xlu1 %1327 }
 0x55e   : > { %v1329_v6 = vsub.f32 %v1323_v2, %v1328_v5 }
 0x560   : > { %v1330_v7 = vmul.f32 1.442695, %v1329_v6 }
 0x561   : > { %v1490_v9 = vpop.permute.xlu1 %1489 }
 0x562   : > { %2250 = vpow2.f32 %v1330_v7 }
 0x56f   : > { %v2251_v8 = vpop.eup %2250 }
 0x570   : > { %2095 = vmatmul.mubr.msk.f32.vlgmr.msra.gmra.mxu1 %vm775_vm2, %v2251_v8  ;;  %v1332_v10 = vsel %vm775_vm2, %v2251_v8, 0.0 }
 0x571   : > { %2103 = vmatpush3.xpose.msk.msra.mxu1 %vm775_vm2, %v1490_v9  ;;  %1333 = vadd.xlane.f32.xlu0 %v1332_v10 }
 0x572   : > { %2104 = vmatprep.mubr.msk.f32.mxu1 %vm2587_vm0, %v2586_v0  ;;  %2112 = vmatprep.subr.mxu1 %v2586_v0 }
 0x574   : > { %2105 = vmatmul.mubr.msk.f32.vlgmr.msra.gmra.mxu1 %vm775_vm2, %v1488_v11 }
 0x575   : > { %2114 = vmatprep.mubr.msk.f32.mxu1 %vm2587_vm0, %v2586_v0  ;;  %2113 = vmatpush3.msra.mxu1 %v774_v29 }
 0x587   : > { %1574 = vrot.lane.b32.xlu0 %v2919_v21, %s2590_s22 }
 0x5fa   : > { %v1334_v13 = vpop.xlane.xlu0 %1333 }
 0x5fb   : > { %2252 = vrcp.f32 %v1334_v13 }
 0x5fe   : > { %v1575_v18 = vpop.permute.xlu0 %1574 }
 0x608   : > { %v2253_v14 = vpop.eup %2252 }
 0x630   : > { %v1407_v15 = vpop.f32.mrf.mxu1 }
 0x631   : > { %v1412_v16 = vmul.f32 %v2253_v14, %v1407_v15 }
 0x632   : > { %v2096_v17 = vpop.f32.mrf.mxu1 }
 0x633   : > { %2100 = vmatmul.mubr.msk.f32.vlgmr.msra.gmra.mxu0 %vm775_vm2, %v1412_v16 }
 0x634   : > { %2108 = vmatpush3.msra.mxu0 %v1575_v18  ;;  %v1561_v19 = vpop.f32.mrf.mxu1  ;;  %2109 = vmatprep.mubr.msk.f32.mxu0 %vm2587_vm0, %v2586_v0  ;;  %v1245_v0 = vadd.f32 %v1244_v60, %v1171_v62 }
 0x635   : > { %v1562_v20 = vadd.f32 %v1561_v19, %v2933_v25 }
 0x636   : > { %v2106_v21 = vpop.f32.mrf.mxu1 }
 0x637   : > { %v1565_v22 = vsel %vm775_vm2, %v1562_v20, -inf }
 0x638   : > { %1566 = vmax.xlane.f32.xlu1 %v1565_v22 }
 0x6c1   : > { %v1567_v23 = vpop.xlane.xlu1 %1566 }
 0x6c2   : > { %v1568_v24 = vsub.f32 %v1562_v20, %v1567_v23 }
 0x6c4   : > { %v1569_v26 = vmul.f32 1.442695, %v1568_v24 }
 0x6c6   : > { %2254 = vpow2.f32 %v1569_v26 }
 0x6d3   : > { %v2255_v27 = vpop.eup %2254 }
 0x6d4   : > { %2110 = vmatmul.mubr.msk.f32.vlgmr.msra.gmra.mxu0 %vm775_vm2, %v2255_v27  ;;  %v1571_v28 = vsel %vm775_vm2, %v2255_v27, 0.0 }
 0x6d5   : > { %1572 = vadd.xlane.f32.xlu1 %v1571_v28 }
 0x6f3   : > { %v1482_v25 = vpop.f32.mrf.mxu0 }
 0x6f4   : > { %v1486_v30 = vadd.f32 %v1482_v25, %v1245_v0 }
 0x6f5   : > { %v2101_v31 = vpop.f32.mrf.mxu0 }
 0x75e   : > { %v1573_v32 = vpop.xlane.xlu1 %1572 }
 0x75f   : > { %2256 = vrcp.f32 %v1573_v32 }
 0x76c   : > { %v2257_v33 = vpop.eup %2256 }
 0x794   : > { %v1646_v34 = vpop.f32.mrf.mxu0 }
 0x795   : > { %v1651_v35 = vmul.f32 %v2257_v33, %v1646_v34 }
 0x796   : > { %v2111_v36 = vpop.f32.mrf.mxu0 }
 0x797   : > { %2115 = vmatmul.mubr.msk.f32.vlgmr.msra.gmra.mxu1 %vm775_vm2, %v1651_v35 }
 0x857   : > { %v1721_v37 = vpop.f32.mrf.mxu1 }
 0x858   : > { %v1725_v39 = vadd.f32 %v1721_v37, %v1486_v30 }
 0x859   : > { %v2116_v40 = vpop.f32.mrf.mxu1 }
 0x85a   : > { %v1733_v41 = vadd.f32 %v1980_v38, %v1725_v39 }
 0x85c   : > { %1734 = vst.msk [vmem:[%s533_s30] sm:$0xff] %vm539_vm1, %v1733_v41 }
 0x85d   : > { %2487 = shalt.err (!%p2484_p12)
}
 0x85e   : > { %s2488_s5 = scalar_lea.hbm %s1748_s20, 128  ;;  %s2492_s21 = scalar_lea.hbm %s3097_s9, 256 }
 0x85f   : > { %p2489_p1 = scmp.ne.s32.totalorder %s1748_s20, %s2488_s5  ;;  %p2493_p9 = scmp.lt.s32.totalorder %s1748_s20, %s3097_s9 }
 0x860   : > { %p2494_p11 = scmp.lt.s32.totalorder %s2492_s21, %s2488_s5 }
 0x861   : > { %p2490_p8 = pnand %p2489_p1, %p3098_p2 }
 0x862   : > { %p2495_p13 = por %p2494_p11, %p2493_p9 }
 0x863   : > { %p2491_p3 = pneg %p2490_p8 }
 0x865   : > { %p2496_p4 = pnand %p2495_p13, %p2491_p3 }
 0x867   : > { %2499 = shalt.err (!%p2496_p4)
}
 0x868   : > { %2141 = dma.vmem_to_hbm [thread:$0]  (%p3098_p2), %s1751_s4, 128, %s1748_s20, %s1736_s18  }
 0x869 PF: > { %s3099_s17 = sld [smem:[#allocation24_spill]]  ;;  %p3102_p10 = scmp.ge.s32.totalorder %s2574_s14, 2 }
 0x86a   : > { %s3100_s22 = sld [smem:[#allocation26_spill]] }
 0x86f   : > { %s1762_s1 = sand.u32 1, %s3099_s17  }
 0x870   : > { %p3101_p0 = scmp.ne.s32.totalorder %s3100_s22, 0  ;;  %s1763_s25 = scalar_lea.sflag [#allocation4], %s1762_s1 }
 0x872   : > { %p2170_p6 = pnand %p3102_p10, %p3101_p0 }
 0x874   : > { %p2171_p5 = pneg %p2170_p6 }
 0x876   : > { %2549 = dma.done.wait (%p2171_p5), %s1763_s25, 128  }
 0x877   : > { %2551 = vsyncadd (%p2171_p5), %s1763_s25, 4294967168  ;;  %s33_s14 = sadd.s32 1, %s2574_s14   ;;  %s3103_s27 = sld [smem:[#allocation28_spill]] }
 0x878   : > { %p30_p7 = scmp.ge.s32.totalorder %s33_s14, 4   ;;  %s3104_s12 = sld [smem:[#allocation25_spill]] }
 0x879   : > { %s3105_s13 = sld [smem:[#allocation27_spill]]  ;;  %s3106_s30 = smov %s2558_s10 }
 0x87a   : > { %s3107_s10 = smov %s2562_s11  ;;  %32 = sbr.rel (!%p30_p7) target bundleno = 18 (0x12), region = 154 }
 0x87d   : > { %s3108_s11 = smov %s3103_s27 }
 0x87f   :  { %1768 = vsyncpa [#allocation3], 1 }
 0x880   :  { %1770 = vsyncpa [#allocation3 + $0x1], 1 }
 0x881   :  { %1771 = vsyncpa [#allocation6], 1 }
 0x882   :  { %1773 = vsyncpa [#allocation6 + $0x1], 1 }
 0x883   :  { %1774 = vsyncpa [#allocation9], 1 }
 0x884   :  { %1776 = vsyncpa [#allocation9 + $0x1], 1 }
 0x885   :  { %1777 = vsyncpa [#allocation12], 1 }
 0x886   :  { %1778 = vsyncpa [#allocation15], 1 }
 0x887   :  { %1779 = vsyncpa [#allocation4], 1 }
 0x888   :  { %1781 = vsyncpa [#allocation4 + $0x1], 1 }

</bundles_post_ra>
